<compile_context>
chip_gen: v7x
topology: tpu7x:2x2x1
jax: 0.10.0
libtpu: 0.0.40
codegen_flags: <defaults>
</compile_context>

<pallas_src>
import jax
import jax.numpy as jnp
from jax.experimental import pallas as pl
from jax.experimental.pallas import tpu as pltpu


def mlp_kernel(y_ref, w1_ref, b1_ref, w2_ref, b2_ref, w3_ref, b3_ref,
               w4_ref, b4_ref, o_ref):
    y = y_ref[...]                                                    # (5, B)

    # Layer 1: Linear(5, 64) + ReLU on the MXU (K=5 pads to a full pass, which is
    # free here — the binding slot is the VALU, not the MXU push slot).
    h = jnp.dot(w1_ref[...], y, preferred_element_type=jnp.float32) + b1_ref[...]
    h = jnp.maximum(h, 0.0)                                           # (64, B)

    # Layers 2, 3: Linear(64, 64) + ReLU on the MXU (f32 accumulation).
    h = jnp.dot(w2_ref[...], h, preferred_element_type=jnp.float32) + b2_ref[...]
    h = jnp.maximum(h, 0.0)
    h = jnp.dot(w3_ref[...], h, preferred_element_type=jnp.float32) + b3_ref[...]
    h = jnp.maximum(h, 0.0)

    # Layer 4: Linear(64, 1) as VPU multiply + cross-sublane reduce (XLU).
    # Output stays lane-dense: (1, B).
    o_ref[...] = jnp.sum(h * w4_ref[...], axis=0, keepdims=True) + b4_ref[...]


def _round_up(x, m):
    return ((x + m - 1) // m) * m


def ode_func_mean_forward(t, y, params, *, block_n=8192):
    """Pallas implementation of ODEFuncMean.forward(t, y) = net(y).

    t is unused (matches the PyTorch module). y: (N, 5) -> (N, 1), float32.
    block_n: desired batch tile (multiple of 128).  It is clamped for small N and
    capped so the grid has at least two blocks when N spans more than one 128-lane
    tile, so both v7x TensorCores receive work.
    """
    del t
    (w1, b1), (w2, b2), (w3, b3), (w4c, b4) = params
    N = y.shape[0]
    assert block_n % 128 == 0, "block_n must be a multiple of 128 (lane width)"

    n128 = _round_up(max(N, 1), 128)
    bn = min(block_n, n128)                       # don't over-pad tiny batches
    if n128 >= 256:                               # v7x megacore: prefer >= 2 blocks
        bn = min(bn, _round_up(pl.cdiv(n128, 2), 128))
    bn = max(bn, 128)

    n_blocks = pl.cdiv(N, bn)
    n_pad = n_blocks * bn

    # Batch-on-lanes layout: (5, N_pad); padded columns compute net(0) and are sliced off.
    y_t = jnp.pad(y.astype(jnp.float32).T, ((0, 0), (0, n_pad - N)))

    # Constant index maps -> the pipeline DMAs these once and keeps them resident.
    resident = lambda shape: pl.BlockSpec(shape, lambda i: (0, 0))

    out_t = pl.pallas_call(
        mlp_kernel,
        out_shape=jax.ShapeDtypeStruct((1, n_pad), jnp.float32),
        grid=(n_blocks,),
        in_specs=[
            pl.BlockSpec((5, bn), lambda i: (0, i)),        # y tile (lane dense)
            resident((64, 5)), resident((64, 1)),           # layer 1
            resident((64, 64)), resident((64, 1)),          # layer 2
            resident((64, 64)), resident((64, 1)),          # layer 3
            resident((64, 1)), resident((1, 1)),            # layer 4
        ],
        out_specs=pl.BlockSpec((1, bn), lambda i: (0, i)),  # lane-dense output
        compiler_params=pltpu.CompilerParams(
            dimension_semantics=("parallel",),
            vmem_limit_bytes=32 * 1024 * 1024),
    )(y_t, w1, b1, w2, b2, w3, b3, w4c, b4)

    return out_t[:, :N].T                                   # (N, 1)


def init_params(key):
    """Matches the torch init: weight ~ N(0, 0.1), bias = 0.
    Weights stay torch-native (out_features, in_features); biases are stored as
    (out_features, 1) columns and the last layer's weight as a (64, 1) column to
    match the kernel's batch-on-lanes layout."""
    sizes = [(64, 5), (64, 64), (64, 64), (1, 64)]
    raw = []
    for out_f, in_f in sizes:
        key, sub = jax.random.split(key)
        w = 0.1 * jax.random.normal(sub, (out_f, in_f), dtype=jnp.float32)
        b = jnp.zeros((out_f, 1), dtype=jnp.float32)
        raw.append((w, b))
    (w1, b1), (w2, b2), (w3, b3), (w4, b4) = raw
    return ((w1, b1), (w2, b2), (w3, b3), (w4.T, b4))        # w4.T: (64, 1); b4: (1, 1)


def reference_forward(y, params):
    """Pure-JAX reference in the same batch-on-lanes formulation (f32)."""
    (w1, b1), (w2, b2), (w3, b3), (w4c, b4) = params
    hi = jax.lax.Precision.HIGHEST
    h = y.astype(jnp.float32).T                                          # (5, N)
    h = jnp.maximum(jnp.dot(w1, h, precision=hi) + b1, 0.0)
    h = jnp.maximum(jnp.dot(w2, h, precision=hi) + b2, 0.0)
    h = jnp.maximum(jnp.dot(w3, h, precision=hi) + b3, 0.0)
    out = jnp.sum(w4c * h, axis=0, keepdims=True) + b4                   # (1, N)
    return out.T                                                         # (N, 1)


if __name__ == "__main__":
    key = jax.random.PRNGKey(0)
    pkey, ykey = jax.random.split(key)
    params = init_params(pkey)

    N = 300                  # deliberately not a tile multiple: exercises padding and
                             # the small-batch clamp (bn becomes 256 -> 2 grid blocks)
    y = jax.random.normal(ykey, (N, 5), dtype=jnp.float32)
    t = jnp.float32(0.0)     # unused, mirrors the torch signature

    out = ode_func_mean_forward(t, y, params)
    out = jax.block_until_ready(out)

    ref = reference_forward(y, params)
    assert out.shape == (N, 1)
    assert jnp.allclose(out, ref, atol=1e-4, rtol=1e-3), \
        float(jnp.max(jnp.abs(out - ref)))

    print("KERNEL_OK")
</pallas_src>

<mosaic_0001>
module attributes {stable_mosaic.version = 11 : i64} {
  func.func @mlp_kernel(%arg0: i32, %arg1: memref<5x256xf32, #tpu.memory_space<vmem>>, %arg2: memref<64x5xf32, #tpu.memory_space<vmem>>, %arg3: memref<64x1xf32, #tpu.memory_space<vmem>>, %arg4: memref<64x64xf32, #tpu.memory_space<vmem>>, %arg5: memref<64x1xf32, #tpu.memory_space<vmem>>, %arg6: memref<64x64xf32, #tpu.memory_space<vmem>>, %arg7: memref<64x1xf32, #tpu.memory_space<vmem>>, %arg8: memref<64x1xf32, #tpu.memory_space<vmem>>, %arg9: memref<1x1xf32, #tpu.memory_space<vmem>>, %arg10: memref<1x256xf32, #tpu.memory_space<vmem>>) attributes {dimension_semantics = [#tpu.dimension_semantics<parallel>], iteration_bounds = array<i64: 2>, scalar_prefetch = 0 : i64, scratch_operands = 0 : i64, tpu.core_type = #tpu.core_type<tc>, window_params = [{transform_indices = @transform_0, window_bounds = array<i64: 5, 256>}, {pipeline_mode = #tpu.pipeline_mode<synchronous>, transform_indices = @transform_1, window_bounds = array<i64: 64, 5>}, {pipeline_mode = #tpu.pipeline_mode<synchronous>, transform_indices = @transform_2, window_bounds = array<i64: 64, 1>}, {pipeline_mode = #tpu.pipeline_mode<synchronous>, transform_indices = @transform_3, window_bounds = array<i64: 64, 64>}, {pipeline_mode = #tpu.pipeline_mode<synchronous>, transform_indices = @transform_4, window_bounds = array<i64: 64, 1>}, {pipeline_mode = #tpu.pipeline_mode<synchronous>, transform_indices = @transform_5, window_bounds = array<i64: 64, 64>}, {pipeline_mode = #tpu.pipeline_mode<synchronous>, transform_indices = @transform_6, window_bounds = array<i64: 64, 1>}, {pipeline_mode = #tpu.pipeline_mode<synchronous>, transform_indices = @transform_7, window_bounds = array<i64: 64, 1>}, {pipeline_mode = #tpu.pipeline_mode<synchronous>, transform_indices = @transform_8, window_bounds = array<i64: 1, 1>}, {transform_indices = @transform_9, window_bounds = array<i64: 1, 256>}]} {
    %c0 = arith.constant 0 : index
    %c0_0 = arith.constant 0 : index
    %0 = vector.load %arg1[%c0, %c0_0] : memref<5x256xf32, #tpu.memory_space<vmem>>, vector<5x256xf32>
    %c0_1 = arith.constant 0 : index
    %c0_2 = arith.constant 0 : index
    %1 = vector.load %arg2[%c0_1, %c0_2] : memref<64x5xf32, #tpu.memory_space<vmem>>, vector<64x5xf32>
    %cst = arith.constant dense<0.000000e+00> : vector<64x256xf32>
    %2 = tpu.matmul %1, %0, %cst {dimension_numbers = #tpu.dot_dimension_numbers<[1], [0], [0], [1], [0, 0, 1, 1], [], []>} : vector<64x5xf32>, vector<5x256xf32>, vector<64x256xf32> -> vector<64x256xf32>
    %c0_3 = arith.constant 0 : index
    %c0_4 = arith.constant 0 : index
    %3 = vector.load %arg3[%c0_3, %c0_4] : memref<64x1xf32, #tpu.memory_space<vmem>>, vector<64x1xf32>
    %4 = vector.broadcast %3 : vector<64x1xf32> to vector<64x256xf32>
    %5 = arith.addf %2, %4 : vector<64x256xf32>
    %cst_5 = arith.constant 0.000000e+00 : f32
    %6 = vector.broadcast %cst_5 : f32 to vector<64x256xf32>
    %7 = arith.maximumf %5, %6 : vector<64x256xf32>
    %c0_6 = arith.constant 0 : index
    %c0_7 = arith.constant 0 : index
    %8 = vector.load %arg4[%c0_6, %c0_7] : memref<64x64xf32, #tpu.memory_space<vmem>>, vector<64x64xf32>
    %cst_8 = arith.constant dense<0.000000e+00> : vector<64x256xf32>
    %9 = tpu.matmul %8, %7, %cst_8 {dimension_numbers = #tpu.dot_dimension_numbers<[1], [0], [0], [1], [0, 0, 1, 1], [], []>} : vector<64x64xf32>, vector<64x256xf32>, vector<64x256xf32> -> vector<64x256xf32>
    %c0_9 = arith.constant 0 : index
    %c0_10 = arith.constant 0 : index
    %10 = vector.load %arg5[%c0_9, %c0_10] : memref<64x1xf32, #tpu.memory_space<vmem>>, vector<64x1xf32>
    %11 = vector.broadcast %10 : vector<64x1xf32> to vector<64x256xf32>
    %12 = arith.addf %9, %11 : vector<64x256xf32>
    %cst_11 = arith.constant 0.000000e+00 : f32
    %13 = vector.broadcast %cst_11 : f32 to vector<64x256xf32>
    %14 = arith.maximumf %12, %13 : vector<64x256xf32>
    %c0_12 = arith.constant 0 : index
    %c0_13 = arith.constant 0 : index
    %15 = vector.load %arg6[%c0_12, %c0_13] : memref<64x64xf32, #tpu.memory_space<vmem>>, vector<64x64xf32>
    %cst_14 = arith.constant dense<0.000000e+00> : vector<64x256xf32>
    %16 = tpu.matmul %15, %14, %cst_14 {dimension_numbers = #tpu.dot_dimension_numbers<[1], [0], [0], [1], [0, 0, 1, 1], [], []>} : vector<64x64xf32>, vector<64x256xf32>, vector<64x256xf32> -> vector<64x256xf32>
    %c0_15 = arith.constant 0 : index
    %c0_16 = arith.constant 0 : index
    %17 = vector.load %arg7[%c0_15, %c0_16] : memref<64x1xf32, #tpu.memory_space<vmem>>, vector<64x1xf32>
    %18 = vector.broadcast %17 : vector<64x1xf32> to vector<64x256xf32>
    %19 = arith.addf %16, %18 : vector<64x256xf32>
    %cst_17 = arith.constant 0.000000e+00 : f32
    %20 = vector.broadcast %cst_17 : f32 to vector<64x256xf32>
    %21 = arith.maximumf %19, %20 : vector<64x256xf32>
    %c0_18 = arith.constant 0 : index
    %c0_19 = arith.constant 0 : index
    %22 = vector.load %arg8[%c0_18, %c0_19] : memref<64x1xf32, #tpu.memory_space<vmem>>, vector<64x1xf32>
    %23 = vector.broadcast %22 : vector<64x1xf32> to vector<64x256xf32>
    %24 = arith.mulf %21, %23 : vector<64x256xf32>
    %cst_20 = arith.constant dense<0.000000e+00> : vector<256xf32>
    %25 = vector.multi_reduction <add>, %24, %cst_20 [0] : vector<64x256xf32> to vector<256xf32>
    %26 = vector.shape_cast %25 : vector<256xf32> to vector<1x256xf32>
    %c0_21 = arith.constant 0 : index
    %c0_22 = arith.constant 0 : index
    %27 = vector.load %arg9[%c0_21, %c0_22] : memref<1x1xf32, #tpu.memory_space<vmem>>, vector<1x1xf32>
    %28 = vector.broadcast %27 : vector<1x1xf32> to vector<1x256xf32>
    %29 = arith.addf %26, %28 : vector<1x256xf32>
    %c0_23 = arith.constant 0 : index
    %c0_24 = arith.constant 0 : index
    %30 = vector.load %arg10[%c0_23, %c0_24] : memref<1x256xf32, #tpu.memory_space<vmem>>, vector<1x256xf32>
    tpu.vector_store %arg10[%c0_23, %c0_24], %29 {strides = array<i32>} : memref<1x256xf32, #tpu.memory_space<vmem>>, vector<1x256xf32>,
    return
  }
  func.func @transform_0(%arg0: i32) -> (i32, i32) {
    %c0_i32 = arith.constant 0 : i32
    %c0_i32_0 = arith.constant 0 : i32
    return %c0_i32, %arg0 : i32, i32
  }
  func.func @transform_1(%arg0: i32) -> (i32, i32) {
    %c0_i32 = arith.constant 0 : i32
    %c0_i32_0 = arith.constant 0 : i32
    %c0_i32_1 = arith.constant 0 : i32
    return %c0_i32, %c0_i32_0 : i32, i32
  }
  func.func @transform_2(%arg0: i32) -> (i32, i32) {
    %c0_i32 = arith.constant 0 : i32
    %c0_i32_0 = arith.constant 0 : i32
    %c0_i32_1 = arith.constant 0 : i32
    return %c0_i32, %c0_i32_0 : i32, i32
  }
  func.func @transform_3(%arg0: i32) -> (i32, i32) {
    %c0_i32 = arith.constant 0 : i32
    %c0_i32_0 = arith.constant 0 : i32
    %c0_i32_1 = arith.constant 0 : i32
    return %c0_i32, %c0_i32_0 : i32, i32
  }
  func.func @transform_4(%arg0: i32) -> (i32, i32) {
    %c0_i32 = arith.constant 0 : i32
    %c0_i32_0 = arith.constant 0 : i32
    %c0_i32_1 = arith.constant 0 : i32
    return %c0_i32, %c0_i32_0 : i32, i32
  }
  func.func @transform_5(%arg0: i32) -> (i32, i32) {
    %c0_i32 = arith.constant 0 : i32
    %c0_i32_0 = arith.constant 0 : i32
    %c0_i32_1 = arith.constant 0 : i32
    return %c0_i32, %c0_i32_0 : i32, i32
  }
  func.func @transform_6(%arg0: i32) -> (i32, i32) {
    %c0_i32 = arith.constant 0 : i32
    %c0_i32_0 = arith.constant 0 : i32
    %c0_i32_1 = arith.constant 0 : i32
    return %c0_i32, %c0_i32_0 : i32, i32
  }
  func.func @transform_7(%arg0: i32) -> (i32, i32) {
    %c0_i32 = arith.constant 0 : i32
    %c0_i32_0 = arith.constant 0 : i32
    %c0_i32_1 = arith.constant 0 : i32
    return %c0_i32, %c0_i32_0 : i32, i32
  }
  func.func @transform_8(%arg0: i32) -> (i32, i32) {
    %c0_i32 = arith.constant 0 : i32
    %c0_i32_0 = arith.constant 0 : i32
    %c0_i32_1 = arith.constant 0 : i32
    return %c0_i32, %c0_i32_0 : i32, i32
  }
  func.func @transform_9(%arg0: i32) -> (i32, i32) {
    %c0_i32 = arith.constant 0 : i32
    %c0_i32_0 = arith.constant 0 : i32
    return %c0_i32, %arg0 : i32, i32
  }
}

</mosaic_0001>

<bundles_post_ra>
// kernel: tpu_custom_call.1
= control target key start
LH: loop header
LB: loop body
LE: loop exit
PB: predicated region body
PF: predicated region fallthrough
CT: control target
= control target key end

     0   :  { %s1726_s0 = inlined_call_operand.vmem [shape: f32[5,512], index: 0, kind: input, shape index: {}]   ;;  %s1727_s1 = inlined_call_operand.vmem [shape: f32[64,5], index: 1, kind: input, shape index: {}]   ;;  %s1728_s2 = inlined_call_operand.vmem [shape: f32[64,1], index: 2, kind: input, shape index: {}]   ;;  %s1729_s3 = inlined_call_operand.vmem [shape: f32[64,64], index: 3, kind: input, shape index: {}]   ;;  %s1730_s4 = inlined_call_operand.vmem [shape: f32[64,1], index: 4, kind: input, shape index: {}]   ;;  %s1731_s5 = inlined_call_operand.vmem [shape: f32[64,64], index: 5, kind: input, shape index: {}]   ;;  %s1732_s6 = inlined_call_operand.vmem [shape: f32[64,1], index: 6, kind: input, shape index: {}]   ;;  %s1733_s7 = inlined_call_operand.vmem [shape: f32[64,1], index: 7, kind: input, shape index: {}]   ;;  %s1734_s8 = inlined_call_operand.<no memory space> [shape: f32[1,1], index: 8, kind: input, shape index: {}]   ;;  %s1735_s9 = inlined_call_operand.hbm [shape: f32[1,512], index: 9, kind: output, shape index: {}]  }
   0x1   :  { %v14_v0 = vstv %s1734_s8 }
   0x2   :  { %15 = vst [vmem:[#allocation2] sm:$0x1] %v14_v0 }
   0x3   :  { %16 = vsyncpa [#allocation4], 0 }
   0x4   :  { %18 = vsyncpa [#allocation4 + $0x1], 0  ;;  %s1411_s11 = smov 0   ;;  %s1413_s12 = smov 0  }
   0x5   :  { %s1415_s13 = smov 0   ;;  %s1417_s14 = smov 0  }
   0x6 LB: > { %s1432_s8 = sadd.s32 4294967295, %s1352_s14   ;;  %s1173_s15 = sadd.s32 4294967294, %s1352_s14   ;;  %s1352_s14 = sphi %s1417_s14, %s1741_s14   ;;  %s1348_s13 = sphi %s1415_s13, %s1740_s13   ;;  %s1344_s12 = sphi %s1413_s12, %s1739_s12   ;;  %s1340_s11 = sphi %s1411_s11, %s1738_s11  }
   0x7   : > { %s1436_s16 = sadd.s32 1, %s1352_s14   ;;  %s225_s17 = sadd.s32 1, %s1348_s13 }
   0x8   : > { %s222_s18 = ssub.s32 %s1352_s14, %s1436_s16  ;;  %p235_p0 = scmp.ne.s32.totalorder %s1348_s13, %s1344_s12 }
   0x9   : > { %p223_p1 = scmp.eq.s32.totalorder %s222_s18, 0  ;;  %p236_p2 = scmp.eq.s32.totalorder %s1432_s8, 1 }
   0xa   : > { %p241_p3 = scmp.ne.s32.totalorder %s1344_s12, %s1340_s11  ;;  %p242_p4 = scmp.eq.s32.totalorder %s1173_s15, 1 }
   0xb   : > { %s1447_s19 = scalar_select %p223_p1, %s1348_s13, %s225_s17  }
   0xc   : > { %p1449_p5 = por %p236_p2, %p235_p0  ;;  %p1453_p6 = por %p242_p4, %p241_p3 }
   0xd   : > { %p1176_p7 = scmp.ge.s32.totalorder %s1352_s14, 1  ;;  %p293_p8 = scmp.lt.s32.totalorder %s1352_s14, 3 }
   0xf   : > { %p294_p9 = pnand %p1176_p7, %p293_p8 }
  0x10   : > { %s1178_s22 = sshll.u32 (!%p294_p9), %s1432_s8, 1  ;;  %v1354_v1 = vmov (!%p294_p9), 0.0   ;;  %v1355_v2 = vmov (!%p294_p9), 0   ;;  %v346_v3 = vld [vmem:[%s1728_s2] sm:$0xff] (!%p294_p9)  ;;  %v348_v4 = vld [vmem:[%s1728_s2 + $0x10] sm:$0xff] (!%p294_p9)  ;;  %vm419_vm0 = vcmask (!%p294_p9), 1044480  }
  0x11   : > { %297 = sbr.rel (%p294_p9) target bundleno = 807 (0x327), region = 56  ;;  %p330_p10 = scmp.lt.s32.totalorder (!%p294_p9), %s1178_s22, 3  ;;  %490 = vmatprep.mubr.f32.mxu0 (!%p294_p9), %v1354_v1  ;;  %514 = vmatprep.mubr.f32.mxu1 (!%p294_p9), %v1354_v1  ;;  %v338_v5 = vld [vmem:[%s1727_s1] sm:$0xff] (!%p294_p9)  ;;  %vm394_vm1 = vcmask (!%p294_p9), 39936   ;;  %v347_v9 = vld [vmem:[%s1728_s2 + $0x8] sm:$0xff] (!%p294_p9)  ;;  %v349_v10 = vld [vmem:[%s1728_s2 + $0x18] sm:$0xff] (!%p294_p9) }
  0x12   : > { %1288 = vset.pattern.permute.xlu0 (!%p294_p9), %v1355_v2  ;;  %1289 = vset.pattern.permute.xlu1 (!%p294_p9), %v1355_v2  ;;  %v342_v8 = vld [vmem:[%s1727_s1 + $0x20] sm:$0xff] (!%p294_p9)  ;;  %v339_v11 = vld [vmem:[%s1727_s1 + $0x8] sm:$0xff] (!%p294_p9)  ;;  %v340_v15 = vld [vmem:[%s1727_s1 + $0x10] sm:$0xff] (!%p294_p9)  ;;  %vm611_vm2 = vcmask (!%p294_p9), 523264   ;;  %s1211_s24 = sshll.u32 (!%p294_p9), %s1432_s8, 5  ;;  %s1357_s8 = smov (!%p294_p9), [#allocation3]  }
  0x13   : > { %356 = vperm.xlu0 (!%p294_p9), %1288, %v346_v3   ;;  %366 = vperm.xlu1 (!%p294_p9), %1289, %v348_v4   ;;  %v343_v12 = vld [vmem:[%s1727_s1 + $0x28] sm:$0xff] (!%p294_p9)  ;;  %v350_v13 = vld [vmem:[%s1728_s2 + $0x20] sm:$0xff] (!%p294_p9)  ;;  %v344_v16 = vld [vmem:[%s1727_s1 + $0x30] sm:$0xff] (!%p294_p9)  ;;  %s1684_s29 = scalar_lea.hbm (!%p294_p9), %s1735_s9, %s1211_s24  ;;  %s1294_s15 = sshll.u32 (!%p294_p9), %s1357_s8, 4  ;;  %s1295_s15 = int_to_ptr.vmem [resolvable:$false] %s1294_s15 }
  0x14   : > { %v351_v14 = vld [vmem:[%s1728_s2 + $0x28] sm:$0xff] (!%p294_p9)  ;;  %v352_v17 = vld [vmem:[%s1728_s2 + $0x30] sm:$0xff] (!%p294_p9)  ;;  %v353_v18 = vld [vmem:[%s1728_s2 + $0x38] sm:$0xff] (!%p294_p9)  ;;  %s1296_s17 = scalar_lea.vmem (!%p294_p9), %s1295_s15, 64 }
  0x15   : > { %v341_v19 = vld [vmem:[%s1727_s1 + $0x18] sm:$0xff] (!%p294_p9)  ;;  %v563_v21 = vld [vmem:[%s1730_s4] sm:$0xff] (!%p294_p9)  ;;  %v564_v22 = vld [vmem:[%s1730_s4 + $0x8] sm:$0xff] (!%p294_p9) }
  0x16   : > { %v345_v20 = vld [vmem:[%s1727_s1 + $0x38] sm:$0xff] (!%p294_p9)  ;;  %v565_v23 = vld [vmem:[%s1730_s4 + $0x10] sm:$0xff] (!%p294_p9)  ;;  %v567_v25 = vld [vmem:[%s1730_s4 + $0x20] sm:$0xff] (!%p294_p9) }
  0x17   : > { %361 = vperm.xlu0 (!%p294_p9), %1288, %v347_v9   ;;  %371 = vperm.xlu1 (!%p294_p9), %1289, %v349_v10   ;;  %v566_v24 = vld [vmem:[%s1730_s4 + $0x18] sm:$0xff] (!%p294_p9)  ;;  %v568_v26 = vld [vmem:[%s1730_s4 + $0x28] sm:$0xff] (!%p294_p9)  ;;  %v569_v27 = vld [vmem:[%s1730_s4 + $0x30] sm:$0xff] (!%p294_p9) }
  0x18   : > { %s1743_s22 = smov (!%p330_p10, %s1178_s22), 3  ;;  %v570_v28 = vld [vmem:[%s1730_s4 + $0x38] sm:$0xff]  ;;  %v773_v29 = vld [vmem:[%s1732_s6] sm:$0xff]  ;;  %v774_v30 = vld [vmem:[%s1732_s6 + $0x8] sm:$0xff] }
  0x19   : > { %s1179_s27 = sshll.u32 %s1743_s22, 3  ;;  %v775_v31 = vld [vmem:[%s1732_s6 + $0x10] sm:$0xff]  ;;  %v776_v32 = vld [vmem:[%s1732_s6 + $0x18] sm:$0xff]  ;;  %v974_v33 = vld [vmem:[%s1733_s7] sm:$0xff]  ;;  %s326_s22 = sand.u32 1, %s1344_s12  }
  0x1a   : > { %s333_s30 = scalar_lea.vmem %s1726_s0, %s1179_s27  ;;  %v975_v34 = vld [vmem:[%s1733_s7 + $0x8] sm:$0xff]  ;;  %v777_v35 = vld [vmem:[%s1732_s6 + $0x20] sm:$0xff]  ;;  %v976_v36 = vld [vmem:[%s1733_s7 + $0x10] sm:$0xff]  ;;  %s1177_s23 = sshll.u32 %s326_s22, 1 }
  0x1b   : > { %v337_v6 = vld [vmem:[%s333_s30 + $0x8] sm:$0x1f]  ;;  %v336_v7 = vld [vmem:[%s333_s30] sm:$0x1f]  ;;  %376 = vperm.xlu0 %1288, %v350_v13   ;;  %381 = vperm.xlu1 %1289, %v351_v14   ;;  %v977_v38 = vld [vmem:[%s1733_s7 + $0x18] sm:$0xff]  ;;  %s328_s25 = scalar_lea.vmem [#allocation3], %s1177_s23 }
  0x1c   : > { %1180 = vmatprep.subr.msk.mxu0 %vm419_vm0, %v337_v6  ;;  %1244 = vmatprep.subr.msk.mxu1 %vm419_vm0, %v337_v6  ;;  %v778_v37 = vld [vmem:[%s1732_s6 + $0x28] sm:$0xff]  ;;  %v779_v39 = vld [vmem:[%s1732_s6 + $0x30] sm:$0xff]  ;;  %v978_v40 = vld [vmem:[%s1733_s7 + $0x20] sm:$0xff]  ;;  %s1114_s26 = sshll.u32 %s328_s25, 4  ;;  %s1100_s30 = scalar_lea.sflag [#allocation4], %s326_s22  ;;  %s1686_s26 = int_to_ptr.vmem [resolvable:$true] %s1114_s26 }
  0x1d   : > { %1181 = vmatpush1.msk.msra.mxu0 %vm419_vm0, %v336_v7  ;;  %1245 = vmatpush1.msk.msra.mxu1 %vm419_vm0, %v336_v7  ;;  %v780_v41 = vld [vmem:[%s1732_s6 + $0x38] sm:$0xff]  ;;  %v979_v42 = vld [vmem:[%s1733_s7 + $0x28] sm:$0xff]  ;;  %v980_v43 = vld [vmem:[%s1733_s7 + $0x30] sm:$0xff]  ;;  %s1290_s10 = scalar_lea.vmem %s1686_s26, 32  ;;  %p1297_p0 = scmp.lt.s32.totalorder %s1686_s26, %s1295_s15 }
  0x1e   : > { %1182 = vmatmul.mubr.msk.f32.vlgmr.msra.gmra.mrb[0].mxu0 %vm394_vm1, %v338_v5  ;;  %1186 = vmatmul.mubr.msk.f32.vlgmr.msra.gmra.mrb[0].mxu1 %vm394_vm1, %v342_v8  ;;  %v981_v44 = vld [vmem:[%s1733_s7 + $0x38] sm:$0xff]  ;;  %v1064_v45 = vld [vmem:[#allocation2] sm:$0x1]  ;;  %p1291_p11 = scmp.ne.s32.totalorder %s1686_s26, %s1290_s10  ;;  %p1298_p1 = scmp.lt.s32.totalorder %s1296_s17, %s1290_s10 }
  0x1f   : > { %496 = vmatprep.mubr.f32.mxu0 %v1354_v1  ;;  %520 = vmatprep.mubr.f32.mxu1 %v1354_v1 }
  0x20   : > { %386 = vperm.xlu0 %1288, %v352_v17   ;;  %391 = vperm.xlu1 %1289, %v353_v18   ;;  %p1292_p12 = pnand %p1291_p11, %p1449_p5  ;;  %p1299_p2 = por %p1298_p1, %p1297_p0 }
  0x22   : > { %1183 = vmatmul.mubr.msk.f32.gmra.mrb[2].mxu0 %vm394_vm1, %v339_v11  ;;  %1187 = vmatmul.mubr.msk.f32.gmra.mrb[2].mxu1 %vm394_vm1, %v343_v12  ;;  %p1293_p13 = pneg %p1292_p12 }
  0x23   : > { %502 = vmatprep.mubr.f32.mxu0 %v1354_v1  ;;  %526 = vmatprep.mubr.f32.mxu1 %v1354_v1 }
  0x24   : > { %573 = vperm.xlu0 %1288, %v563_v21   ;;  %578 = vperm.xlu1 %1289, %v564_v22   ;;  %p1300_p3 = pnand %p1299_p2, %p1293_p13 }
  0x26   : > { %1184 = vmatmul.mubr.msk.f32.gmra.mrb[4].mxu0 %vm394_vm1, %v340_v15  ;;  %1188 = vmatmul.mubr.msk.f32.gmra.mrb[4].mxu1 %vm394_vm1, %v344_v16 }
  0x27   : > { %508 = vmatprep.mubr.f32.mxu0 %v1354_v1  ;;  %532 = vmatprep.mubr.f32.mxu1 %v1354_v1 }
  0x28   : > { %583 = vperm.xlu0 %1288, %v565_v23   ;;  %588 = vperm.xlu1 %1289, %v566_v24  }
  0x2a   : > { %1185 = vmatmul.mubr.msk.f32.gmra.mrb[6].mxu0 %vm394_vm1, %v341_v19  ;;  %1189 = vmatmul.mubr.msk.f32.gmra.mrb[6].mxu1 %vm394_vm1, %v345_v20 }
  0x2b   : > { %700 = vmatprep.mubr.f32.mxu1 %v1354_v1  ;;  %909 = vmatprep.mubr.f32.mxu0 %v1354_v1 }
  0x2c   : > { %593 = vperm.xlu0 %1288, %v567_v25   ;;  %598 = vperm.xlu1 %1289, %v568_v26  }
  0x30   : > { %603 = vperm.xlu0 %1288, %v569_v27   ;;  %608 = vperm.xlu1 %1289, %v570_v28  }
  0x34   : > { %783 = vperm.xlu0 %1288, %v773_v29   ;;  %788 = vperm.xlu1 %1289, %v774_v30  }
  0x38   : > { %793 = vperm.xlu0 %1288, %v775_v31   ;;  %798 = vperm.xlu1 %1289, %v776_v32  }
  0x3c   : > { %984 = vperm.xlu0 %1288, %v974_v33   ;;  %989 = vperm.xlu1 %1289, %v975_v34  }
  0x40   : > { %803 = vperm.xlu0 %1288, %v777_v35   ;;  %994 = vperm.xlu1 %1289, %v976_v36  }
  0x44   : > { %808 = vperm.xlu0 %1288, %v778_v37   ;;  %999 = vperm.xlu1 %1289, %v977_v38  }
  0x48   : > { %813 = vperm.xlu0 %1288, %v779_v39   ;;  %1004 = vperm.xlu1 %1289, %v978_v40  }
  0x4c   : > { %818 = vperm.xlu0 %1288, %v780_v41   ;;  %1009 = vperm.xlu1 %1289, %v979_v42  }
  0x50   : > { %1014 = vperm.xlu0 %1288, %v980_v43   ;;  %1019 = vperm.xlu1 %1289, %v981_v44  }
  0x54   : > { %1067 = vperm.xlu0 %1288, %v1064_v45  }
  0x92   : > { %v357_v46 = vpop.permute.xlu0 %356  ;;  %v367_v47 = vpop.permute.xlu1 %366 }
  0x96   : > { %v362_v48 = vpop.permute.xlu0 %361  ;;  %v372_v49 = vpop.permute.xlu1 %371 }
  0x9a   : > { %v377_v50 = vpop.permute.xlu0 %376  ;;  %v382_v57 = vpop.permute.xlu1 %381 }
  0x9f   : > { %v387_v19 = vpop.permute.xlu0 %386  ;;  %v392_v22 = vpop.permute.xlu1 %391 }
  0xf1   : > { %v492_v51 = vpop.f32.mrb[0].mxu0  ;;  %v516_v52 = vpop.f32.mrb[0].mxu1 }
  0xf2   : > { %v494_v53 = vpop.f32.mrb[1].mxu0  ;;  %v517_v54 = vadd.f32 %v516_v52, %v377_v50  ;;  %v518_v55 = vpop.f32.mrb[1].mxu1  ;;  %v493_v58 = vadd.f32 %v492_v51, %v357_v46  ;;  %v559_v51 = vld [vmem:[%s1729_s3 + $0x20] sm:$0xff]  ;;  %v560_v52 = vld [vmem:[%s1729_s3 + $0x28] sm:$0xff] }
  0xf3   : > { %v519_v56 = vadd.f32 %v518_v55, %v377_v50  ;;  %v495_v59 = vadd.f32 %v494_v53, %v357_v46  ;;  %v558_v50 = vld [vmem:[%s1729_s3 + $0x18] sm:$0xff]  ;;  %v561_v53 = vld [vmem:[%s1729_s3 + $0x30] sm:$0xff] }
  0xf4   : > { %v547_v62 = vmax.f32 %v517_v54, 0.0  ;;  %v539_v7 = vmax.f32 %v493_v58, 0.0  ;;  %v562_v54 = vld [vmem:[%s1729_s3 + $0x38] sm:$0xff] }
  0xf5   : > { %v498_v60 = vpop.f32.mrb[2].mxu0  ;;  %v522_v61 = vpop.f32.mrb[2].mxu1  ;;  %v548_v4 = vmax.f32 %v519_v56, 0.0  ;;  %v540_v10 = vmax.f32 %v495_v59, 0.0 }
  0xf6   : > { %v499_v63 = vadd.f32 %v498_v60, %v362_v48  ;;  %v523_v0 = vadd.f32 %v522_v61, %v382_v57  ;;  %v500_v2 = vpop.f32.mrb[3].mxu0  ;;  %v524_v3 = vpop.f32.mrb[3].mxu1 }
  0xf7   : > { %v501_v5 = vadd.f32 %v500_v2, %v362_v48  ;;  %v525_v6 = vadd.f32 %v524_v3, %v382_v57  ;;  %v556_v48 = vld [vmem:[%s1729_s3 + $0x8] sm:$0xff]  ;;  %v574_v57 = vpop.permute.xlu0 %573  ;;  %v579_v59 = vpop.permute.xlu1 %578 }
  0xf8   : > { %v541_v8 = vmax.f32 %v499_v63, 0.0  ;;  %v549_v9 = vmax.f32 %v523_v0, 0.0 }
  0xf9   : > { %v542_v11 = vmax.f32 %v501_v5, 0.0  ;;  %v550_v12 = vmax.f32 %v525_v6, 0.0  ;;  %v504_v13 = vpop.f32.mrb[4].mxu0  ;;  %v528_v14 = vpop.f32.mrb[4].mxu1 }
  0xfa   : > { %v1214_v15 = vpack.c.bf16 %v541_v8, %v539_v7  ;;  %v1222_v16 = vpack.c.bf16 %v549_v9, %v547_v62  ;;  %v506_v17 = vpop.f32.mrb[5].mxu0  ;;  %v530_v18 = vpop.f32.mrb[5].mxu1  ;;  %v505_v23 = vadd.f32 %v504_v13, %v367_v47  ;;  %v529_v24 = vadd.f32 %v528_v14, %v387_v19 }
  0xfb   : > { %v1212_v20 = vpack.c.bf16 %v542_v11, %v540_v10  ;;  %v1220_v21 = vpack.c.bf16 %v550_v12, %v548_v4  ;;  %v507_v25 = vadd.f32 %v506_v17, %v367_v47  ;;  %v531_v26 = vadd.f32 %v530_v18, %v387_v19  ;;  %v555_v47 = vld [vmem:[%s1729_s3] sm:$0xff]  ;;  %v584_v9 = vpop.permute.xlu0 %583  ;;  %v589_v12 = vpop.permute.xlu1 %588 }
  0xfc   : > { %v543_v35 = vmax.f32 %v505_v23, 0.0  ;;  %v551_v36 = vmax.f32 %v529_v24, 0.0 }
  0xfd   : > { %v510_v27 = vpop.f32.mrb[6].mxu0  ;;  %v534_v28 = vpop.f32.mrb[6].mxu1  ;;  %1213 = vmatprep.subr.bf16.mxu1 %v1212_v20  ;;  %v544_v39 = vmax.f32 %v507_v25, 0.0  ;;  %v552_v40 = vmax.f32 %v531_v26, 0.0 }
  0xfe   : > { %v511_v29 = vadd.f32 %v510_v27, %v372_v49  ;;  %v535_v30 = vadd.f32 %v534_v28, %v392_v22  ;;  %v512_v31 = vpop.f32.mrb[7].mxu0  ;;  %v536_v32 = vpop.f32.mrb[7].mxu1  ;;  %1215 = vmatpush1.bf16.msra.mxu1 %v1214_v15 }
  0xff   : > { %v513_v33 = vadd.f32 %v512_v31, %v372_v49  ;;  %v537_v34 = vadd.f32 %v536_v32, %v392_v22  ;;  %v557_v49 = vld [vmem:[%s1729_s3 + $0x10] sm:$0xff]  ;;  %v594_v25 = vpop.permute.xlu0 %593  ;;  %v599_v28 = vpop.permute.xlu1 %598 }
 0x100   : > { %v545_v37 = vmax.f32 %v511_v29, 0.0  ;;  %v553_v38 = vmax.f32 %v535_v30, 0.0 }
 0x101   : > { %v546_v41 = vmax.f32 %v513_v33, 0.0  ;;  %v554_v42 = vmax.f32 %v537_v34, 0.0 }
 0x102   : > { %v1218_v43 = vpack.c.bf16 %v545_v37, %v543_v35  ;;  %v1226_v44 = vpack.c.bf16 %v553_v38, %v551_v36 }
 0x103   : > { %v1216_v45 = vpack.c.bf16 %v546_v41, %v544_v39  ;;  %v1224_v46 = vpack.c.bf16 %v554_v42, %v552_v40  ;;  %v604_v41 = vpop.permute.xlu0 %603 }
 0x105   : > { %1217 = vmatprep.subr.bf16.mxu1 %v1216_v45 }
 0x106   : > { %1219 = vmatpush1.bf16.msra.mxu1 %v1218_v43 }
 0x107   : > { %1221 = vmatprep.subr.bf16.mxu1 %v1220_v21 }
 0x10a   : > { %1223 = vmatpush1.bf16.msra.mxu1 %v1222_v16 }
 0x10b   : > { %1225 = vmatprep.subr.bf16.mxu1 %v1224_v46 }
 0x10e   : > { %1227 = vmatpush1.bf16.msra.mxu1 %v1226_v44  ;;  %v609_v44 = vpop.permute.xlu1 %608 }
 0x111   : > { %1190 = vmatmul.mubr.msk.f32.vlgmr.msra.gmra.mrb[8].mxu1 %vm611_vm2, %v555_v47 }
 0x112   : > { %706 = vmatprep.mubr.f32.mxu1 %v1354_v1 }
 0x115   : > { %1191 = vmatmul.mubr.msk.f32.gmra.mrb[10].mxu1 %vm611_vm2, %v556_v48 }
 0x116   : > { %712 = vmatprep.mubr.f32.mxu1 %v1354_v1 }
 0x119   : > { %1192 = vmatmul.mubr.msk.f32.gmra.mrb[12].mxu1 %vm611_vm2, %v557_v49 }
 0x11a   : > { %718 = vmatprep.mubr.f32.mxu1 %v1354_v1 }
 0x11d   : > { %1193 = vmatmul.mubr.msk.f32.gmra.mrb[14].mxu1 %vm611_vm2, %v558_v50 }
 0x11e   : > { %724 = vmatprep.mubr.f32.mxu1 %v1354_v1 }
 0x121   : > { %1194 = vmatmul.mubr.msk.f32.gmra.mrb[16].mxu1 %vm611_vm2, %v559_v51 }
 0x122   : > { %730 = vmatprep.mubr.f32.mxu1 %v1354_v1 }
 0x125   : > { %1195 = vmatmul.mubr.msk.f32.gmra.mrb[18].mxu1 %vm611_vm2, %v560_v52 }
 0x126   : > { %736 = vmatprep.mubr.f32.mxu1 %v1354_v1 }
 0x129   : > { %1196 = vmatmul.mubr.msk.f32.gmra.mrb[20].mxu1 %vm611_vm2, %v561_v53 }
 0x12a   : > { %742 = vmatprep.mubr.f32.mxu1 %v1354_v1 }
 0x12d   : > { %1197 = vmatmul.mubr.msk.f32.gmra.mrb[22].mxu1 %vm611_vm2, %v562_v54 }
 0x1e4   : > { %v702_v55 = vpop.f32.mrb[8].mxu1 }
 0x1e5   : > { %v704_v56 = vpop.f32.mrb[9].mxu1  ;;  %v703_v58 = vadd.f32 %v702_v55, %v574_v57 }
 0x1e6   : > { %v705_v60 = vadd.f32 %v704_v56, %v574_v57  ;;  %v765_v56 = vld [vmem:[%s1731_s5] sm:$0xff]  ;;  %v766_v57 = vld [vmem:[%s1731_s5 + $0x8] sm:$0xff] }
 0x1e7   : > { %v749_v2 = vmax.f32 %v703_v58, 0.0  ;;  %v767_v58 = vld [vmem:[%s1731_s5 + $0x10] sm:$0xff] }
 0x1e8   : > { %v708_v61 = vpop.f32.mrb[10].mxu1  ;;  %v750_v4 = vmax.f32 %v705_v60, 0.0  ;;  %v769_v60 = vld [vmem:[%s1731_s5 + $0x20] sm:$0xff] }
 0x1e9   : > { %v709_v62 = vadd.f32 %v708_v61, %v579_v59  ;;  %v710_v63 = vpop.f32.mrb[11].mxu1  ;;  %v770_v61 = vld [vmem:[%s1731_s5 + $0x28] sm:$0xff] }
 0x1ea   : > { %v711_v0 = vadd.f32 %v710_v63, %v579_v59  ;;  %v768_v59 = vld [vmem:[%s1731_s5 + $0x18] sm:$0xff] }
 0x1eb   : > { %v751_v3 = vmax.f32 %v709_v62, 0.0  ;;  %v771_v62 = vld [vmem:[%s1731_s5 + $0x30] sm:$0xff]  ;;  %v772_v63 = vld [vmem:[%s1731_s5 + $0x38] sm:$0xff] }
 0x1ec   : > { %v752_v5 = vmax.f32 %v711_v0, 0.0  ;;  %v714_v6 = vpop.f32.mrb[12].mxu1  ;;  %v784_v0 = vpop.permute.xlu0 %783 }
 0x1ed   : > { %v1230_v7 = vpack.c.bf16 %v751_v3, %v749_v2  ;;  %v716_v8 = vpop.f32.mrb[13].mxu1  ;;  %v715_v11 = vadd.f32 %v714_v6, %v584_v9  ;;  %v789_v2 = vpop.permute.xlu1 %788 }
 0x1ee   : > { %v1228_v10 = vpack.c.bf16 %v752_v5, %v750_v4  ;;  %v717_v13 = vadd.f32 %v716_v8, %v584_v9 }
 0x1ef   : > { %v753_v18 = vmax.f32 %v715_v11, 0.0 }
 0x1f0   : > { %v720_v14 = vpop.f32.mrb[14].mxu1  ;;  %1229 = vmatprep.subr.bf16.mxu0 %v1228_v10  ;;  %v754_v20 = vmax.f32 %v717_v13, 0.0  ;;  %v794_v3 = vpop.permute.xlu0 %793 }
 0x1f1   : > { %v721_v15 = vadd.f32 %v720_v14, %v589_v12  ;;  %v722_v16 = vpop.f32.mrb[15].mxu1  ;;  %1231 = vmatpush1.bf16.msra.mxu0 %v1230_v7  ;;  %v799_v4 = vpop.permute.xlu1 %798 }
 0x1f2   : > { %v723_v17 = vadd.f32 %v722_v16, %v589_v12 }
 0x1f3   : > { %v755_v19 = vmax.f32 %v721_v15, 0.0 }
 0x1f4   : > { %v756_v21 = vmax.f32 %v723_v17, 0.0  ;;  %v726_v22 = vpop.f32.mrb[16].mxu1  ;;  %v985_v5 = vpop.permute.xlu0 %984 }
 0x1f5   : > { %v1234_v23 = vpack.c.bf16 %v755_v19, %v753_v18  ;;  %v728_v24 = vpop.f32.mrb[17].mxu1  ;;  %v727_v27 = vadd.f32 %v726_v22, %v594_v25  ;;  %v990_v6 = vpop.permute.xlu1 %989 }
 0x1f6   : > { %v1232_v26 = vpack.c.bf16 %v756_v21, %v754_v20  ;;  %v729_v29 = vadd.f32 %v728_v24, %v594_v25 }
 0x1f7   : > { %v757_v34 = vmax.f32 %v727_v27, 0.0 }
 0x1f8   : > { %v732_v30 = vpop.f32.mrb[18].mxu1  ;;  %1233 = vmatprep.subr.bf16.mxu0 %v1232_v26  ;;  %v758_v36 = vmax.f32 %v729_v29, 0.0  ;;  %v804_v11 = vpop.permute.xlu0 %803 }
 0x1f9   : > { %v733_v31 = vadd.f32 %v732_v30, %v599_v28  ;;  %v734_v32 = vpop.f32.mrb[19].mxu1  ;;  %1235 = vmatpush1.bf16.msra.mxu0 %v1234_v23  ;;  %v995_v15 = vpop.permute.xlu1 %994 }
 0x1fa   : > { %v735_v33 = vadd.f32 %v734_v32, %v599_v28 }
 0x1fb   : > { %v759_v35 = vmax.f32 %v733_v31, 0.0 }
 0x1fc   : > { %v760_v37 = vmax.f32 %v735_v33, 0.0  ;;  %v738_v38 = vpop.f32.mrb[20].mxu1  ;;  %v809_v25 = vpop.permute.xlu0 %808 }
 0x1fd   : > { %v1238_v39 = vpack.c.bf16 %v759_v35, %v757_v34  ;;  %v740_v40 = vpop.f32.mrb[21].mxu1  ;;  %v739_v43 = vadd.f32 %v738_v38, %v604_v41  ;;  %v1000_v31 = vpop.permute.xlu1 %999 }
 0x1fe   : > { %v1236_v42 = vpack.c.bf16 %v760_v37, %v758_v36  ;;  %v741_v45 = vadd.f32 %v740_v40, %v604_v41 }
 0x1ff   : > { %v761_v50 = vmax.f32 %v739_v43, 0.0 }
 0x200   : > { %v744_v46 = vpop.f32.mrb[22].mxu1  ;;  %1237 = vmatprep.subr.bf16.mxu0 %v1236_v42  ;;  %v762_v52 = vmax.f32 %v741_v45, 0.0  ;;  %v814_v42 = vpop.permute.xlu0 %813 }
 0x201   : > { %v745_v47 = vadd.f32 %v744_v46, %v609_v44  ;;  %v746_v48 = vpop.f32.mrb[23].mxu1  ;;  %1239 = vmatpush1.bf16.msra.mxu0 %v1238_v39 }
 0x202   : > { %v747_v49 = vadd.f32 %v746_v48, %v609_v44 }
 0x203   : > { %v763_v51 = vmax.f32 %v745_v47, 0.0 }
 0x204   : > { %v764_v53 = vmax.f32 %v747_v49, 0.0  ;;  %v1005_v49 = vpop.permute.xlu1 %1004 }
 0x205   : > { %v1242_v54 = vpack.c.bf16 %v763_v51, %v761_v50 }
 0x206   : > { %v1240_v55 = vpack.c.bf16 %v764_v53, %v762_v52 }
 0x208   : > { %1241 = vmatprep.subr.bf16.mxu0 %v1240_v55 }
 0x209   : > { %1243 = vmatpush1.bf16.msra.mxu0 %v1242_v54 }
 0x20c   : > { %1198 = vmatmul.mubr.msk.f32.vlgmr.msra.gmra.mrb[8].mxu0 %vm611_vm2, %v765_v56 }
 0x20d   : > { %915 = vmatprep.mubr.f32.mxu0 %v1354_v1 }
 0x210   : > { %1199 = vmatmul.mubr.msk.f32.gmra.mrb[10].mxu0 %vm611_vm2, %v766_v57 }
 0x211   : > { %921 = vmatprep.mubr.f32.mxu0 %v1354_v1 }
 0x214   : > { %1200 = vmatmul.mubr.msk.f32.gmra.mrb[12].mxu0 %vm611_vm2, %v767_v58 }
 0x215   : > { %927 = vmatprep.mubr.f32.mxu0 %v1354_v1 }
 0x218   : > { %1201 = vmatmul.mubr.msk.f32.gmra.mrb[14].mxu0 %vm611_vm2, %v768_v59 }
 0x219   : > { %933 = vmatprep.mubr.f32.mxu0 %v1354_v1 }
 0x21c   : > { %1202 = vmatmul.mubr.msk.f32.gmra.mrb[16].mxu0 %vm611_vm2, %v769_v60  ;;  %v819_v60 = vpop.permute.xlu0 %818 }
 0x21d   : > { %939 = vmatprep.mubr.f32.mxu0 %v1354_v1 }
 0x220   : > { %1203 = vmatmul.mubr.msk.f32.gmra.mrb[18].mxu0 %vm611_vm2, %v770_v61 }
 0x221   : > { %945 = vmatprep.mubr.f32.mxu0 %v1354_v1 }
 0x224   : > { %1204 = vmatmul.mubr.msk.f32.gmra.mrb[20].mxu0 %vm611_vm2, %v771_v62 }
 0x225   : > { %951 = vmatprep.mubr.f32.mxu0 %v1354_v1 }
 0x228   : > { %1205 = vmatmul.mubr.msk.f32.gmra.mrb[22].mxu0 %vm611_vm2, %v772_v63 }
 0x2df   : > { %v911_v7 = vpop.f32.mrb[8].mxu0 }
 0x2e0   : > { %v912_v8 = vadd.f32 %v911_v7, %v784_v0  ;;  %v913_v9 = vpop.f32.mrb[9].mxu0 }
 0x2e1   : > { %v914_v10 = vadd.f32 %v913_v9, %v784_v0 }
 0x2e2   : > { %v958_v13 = vmax.f32 %v912_v8, 0.0 }
 0x2e3   : > { %v917_v12 = vpop.f32.mrb[10].mxu0  ;;  %v959_v16 = vmax.f32 %v914_v10, 0.0 }
 0x2e4   : > { %v918_v1 = vadd.f32 %v917_v12, %v789_v2  ;;  %v919_v14 = vpop.f32.mrb[11].mxu0  ;;  %v1022_v21 = vmul.f32 %v985_v5, %v958_v13  ;;  %v1015_v13 = vpop.permute.xlu0 %1014 }
 0x2e5   : > { %v920_v17 = vadd.f32 %v919_v14, %v789_v2  ;;  %v1023_v26 = vmul.f32 %v985_v5, %v959_v16  ;;  %v1010_v2 = vpop.permute.xlu1 %1009 }
 0x2e6   : > { %v960_v18 = vmax.f32 %v918_v1, 0.0 }
 0x2e7   : > { %v961_v19 = vmax.f32 %v920_v17, 0.0  ;;  %v923_v20 = vpop.f32.mrb[12].mxu0 }
 0x2e8   : > { %v1024_v22 = vmul.f32 %v990_v6, %v960_v18  ;;  %v924_v23 = vadd.f32 %v923_v20, %v794_v3  ;;  %v925_v24 = vpop.f32.mrb[13].mxu0 }
 0x2e9   : > { %v1025_v27 = vmul.f32 %v990_v6, %v961_v19  ;;  %v926_v28 = vadd.f32 %v925_v24, %v794_v3 }
 0x2ea   : > { %v1038_v29 = vadd.f32 %v1024_v22, %v1022_v21  ;;  %v962_v30 = vmax.f32 %v924_v23, 0.0  ;;  %v1020_v23 = vpop.permute.xlu1 %1019 }
 0x2eb   : > { %v1051_v32 = vadd.f32 %v1025_v27, %v1023_v26  ;;  %v963_v33 = vmax.f32 %v926_v28, 0.0  ;;  %v929_v34 = vpop.f32.mrb[14].mxu0  ;;  %v1070_v28 = vlaneseq }
 0x2ec   : > { %v1026_v35 = vmul.f32 %v995_v15, %v962_v30  ;;  %v930_v36 = vadd.f32 %v929_v34, %v799_v4  ;;  %v931_v37 = vpop.f32.mrb[15].mxu0 }
 0x2ed   : > { %v1027_v38 = vmul.f32 %v995_v15, %v963_v33  ;;  %v932_v39 = vadd.f32 %v931_v37, %v799_v4  ;;  %v1071_v33 = vshrl.u32 %v1070_v28, 7  ;;  %v1356_v37 = vmov 1966171168  }
 0x2ee   : > { %v1039_v40 = vadd.f32 %v1038_v29, %v1026_v35  ;;  %v964_v41 = vmax.f32 %v930_v36, 0.0  ;;  %vm1096_vm3 = vcmp.lt.s32.totalorder %v1070_v28, 256 }
 0x2ef   : > { %v1052_v43 = vadd.f32 %v1051_v32, %v1027_v38  ;;  %v965_v44 = vmax.f32 %v932_v39, 0.0  ;;  %v935_v45 = vpop.f32.mrb[16].mxu0  ;;  %v1080_v38 = vunpack.c.l.s4 %v1356_v37 }
 0x2f0   : > { %v1028_v46 = vmul.f32 %v1000_v31, %v964_v41  ;;  %v936_v47 = vadd.f32 %v935_v45, %v804_v11  ;;  %v937_v48 = vpop.f32.mrb[17].mxu0 }
 0x2f1   : > { %v1029_v50 = vmul.f32 %v1000_v31, %v965_v44  ;;  %v938_v51 = vadd.f32 %v937_v48, %v804_v11  ;;  %v1081_v45 = vunpack.c.0.s8 %v1080_v38 }
 0x2f2   : > { %v1040_v52 = vadd.f32 %v1039_v40, %v1028_v46  ;;  %v966_v53 = vmax.f32 %v936_v47, 0.0  ;;  %v1072_v40 = vsub.s32 0, %v1071_v33 }
 0x2f3   : > { %v1053_v54 = vadd.f32 %v1052_v43, %v1029_v50  ;;  %v967_v55 = vmax.f32 %v938_v51, 0.0  ;;  %v941_v56 = vpop.f32.mrb[18].mxu0  ;;  %v1084_v51 = vsub.s32 %v1081_v45, %v1071_v33 }
 0x2f4   : > { %v1030_v57 = vmul.f32 %v1005_v49, %v966_v53  ;;  %v942_v58 = vadd.f32 %v941_v56, %v809_v25  ;;  %v943_v59 = vpop.f32.mrb[19].mxu0 }
 0x2f5   : > { %v1031_v61 = vmul.f32 %v1005_v49, %v967_v55  ;;  %v944_v62 = vadd.f32 %v943_v59, %v809_v25 }
 0x2f6   : > { %v1041_v63 = vadd.f32 %v1040_v52, %v1030_v57  ;;  %v968_v0 = vmax.f32 %v942_v58, 0.0 }
 0x2f7   : > { %v1054_v3 = vadd.f32 %v1053_v54, %v1031_v61  ;;  %v969_v4 = vmax.f32 %v944_v62, 0.0  ;;  %v947_v5 = vpop.f32.mrb[20].mxu0 }
 0x2f8   : > { %v1032_v6 = vmul.f32 %v1010_v2, %v968_v0  ;;  %v948_v7 = vadd.f32 %v947_v5, %v814_v42  ;;  %v949_v8 = vpop.f32.mrb[21].mxu0 }
 0x2f9   : > { %v1033_v9 = vmul.f32 %v1010_v2, %v969_v4  ;;  %v950_v10 = vadd.f32 %v949_v8, %v814_v42  ;;  %v1068_v42 = vpop.permute.xlu0 %1067 }
 0x2fa   : > { %v1042_v11 = vadd.f32 %v1041_v63, %v1032_v6  ;;  %v970_v12 = vmax.f32 %v948_v7, 0.0  ;;  %v1073_v47 = vrot.slane %v1068_v42, %v1072_v40 }
 0x2fb   : > { %v1055_v1 = vadd.f32 %v1054_v3, %v1033_v9  ;;  %v971_v14 = vmax.f32 %v950_v10, 0.0  ;;  %v953_v15 = vpop.f32.mrb[22].mxu0 }
 0x2fc   : > { %v1034_v16 = vmul.f32 %v1015_v13, %v970_v12  ;;  %v954_v17 = vadd.f32 %v953_v15, %v819_v60  ;;  %v955_v18 = vpop.f32.mrb[23].mxu0 }
 0x2fd   : > { %v1035_v19 = vmul.f32 %v1015_v13, %v971_v14  ;;  %v956_v20 = vadd.f32 %v955_v18, %v819_v60 }
 0x2fe   : > { %v1043_v21 = vadd.f32 %v1042_v11, %v1034_v16  ;;  %v972_v22 = vmax.f32 %v954_v17, 0.0 }
 0x2ff   : > { %v1056_v24 = vadd.f32 %v1055_v1, %v1035_v19  ;;  %v973_v25 = vmax.f32 %v956_v20, 0.0 }
 0x300   : > { %v1036_v26 = vmul.f32 %v1020_v23, %v972_v22 }
 0x301   : > { %v1037_v27 = vmul.f32 %v1020_v23, %v973_v25 }
 0x302   : > { %v1044_v29 = vadd.f32 %v1043_v21, %v1036_v26 }
 0x303   : > { %v1057_v30 = vadd.f32 %v1056_v24, %v1037_v27 }
 0x304   : > { %v1045_v31 = vrot.slane %v1044_v29, 4 }
 0x305   : > { %v1058_v32 = vrot.slane %v1057_v30, 4 }
 0x306   : > { %v1046_v34 = vadd.f32 %v1045_v31, %v1044_v29 }
 0x307   : > { %v1059_v35 = vadd.f32 %v1058_v32, %v1057_v30 }
 0x308   : > { %v1047_v36 = vrot.slane %v1046_v34, 2 }
 0x309   : > { %v1060_v39 = vrot.slane %v1059_v35, 2 }
 0x30a   : > { %v1048_v41 = vadd.f32 %v1047_v36, %v1046_v34 }
 0x30b   : > { %v1061_v43 = vadd.f32 %v1060_v39, %v1059_v35 }
 0x30c   : > { %v1049_v44 = vrot.slane %v1048_v41, 1 }
 0x30d   : > { %v1062_v46 = vrot.slane %v1061_v43, 1 }
 0x30e   : > { %v1050_v48 = vadd.f32 %v1049_v44, %v1048_v41 }
 0x30f   : > { %v1063_v49 = vadd.f32 %v1062_v46, %v1061_v43 }
 0x310   : > { %v1074_v50 = vadd.f32 %v1073_v47, %v1050_v48 }
 0x311   : > { %v1075_v52 = vadd.f32 %v1073_v47, %v1063_v49 }
 0x313   : > { %v1078_v53 = vcombine.low %v1074_v50, %v1075_v52 }
 0x315   : > { %v1085_v54 = vrot.slane %v1078_v53, %v1084_v51 }
 0x317   : > { %v1092_v55 = vrot.slane %v1085_v54, %v1084_v51 }
 0x319   : > { %1098 = vst.msk [vmem:[%s328_s25] sm:$0x3] %vm1096_vm3, %v1092_v55 }
 0x31a   : > { %1303 = shalt.err (!%p1300_p3)
}
 0x31b   : > { %s1304_s18 = scalar_lea.hbm %s1684_s29, 32  ;;  %s1308_s24 = scalar_lea.hbm %s1735_s9, 64 }
 0x31c   : > { %p1305_p4 = scmp.ne.s32.totalorder %s1684_s29, %s1304_s18  ;;  %p1309_p9 = scmp.lt.u32.totalorder %s1684_s29, %s1735_s9 }
 0x31d   : > { %p1310_p10 = scmp.lt.u32.totalorder %s1308_s24, %s1304_s18  ;;  %p1312_p12 = scmp.lt.u32.totalorder %s1304_s18, %s1684_s29 }
 0x31e   : > { %p1306_p7 = pnand %p1305_p4, %p1449_p5 }
 0x31f   : > { %p1311_p11 = por %p1310_p10, %p1309_p9 }
 0x320   : > { %p1307_p8 = pneg %p1306_p7 }
 0x321   : > { %p1313_p13 = por %p1312_p12, %p1311_p11 }
 0x323   : > { %p1314_p0 = pnand %p1313_p13, %p1307_p8 }
 0x325   : > { %1317 = shalt.err (!%p1314_p0)
}
 0x326   : > { %1246 = dma.vmem_to_hbm [thread:$0]  (%p1449_p5), %s1686_s26, 32, %s1684_s29, %s1100_s30  }
 0x327 PF: > { %p1252_p1 = scmp.ge.s32.totalorder %s1352_s14, 2  ;;  %s1126_s28 = sand.u32 1, %s1340_s11  }
 0x328   : > { %s1127_s10 = scalar_lea.sflag [#allocation4], %s1126_s28 }
 0x329   : > { %p1249_p2 = pnand %p1252_p1, %p1453_p6 }
 0x32b   : > { %1335 = dma.done.wait (!%p1249_p2), %s1127_s10, 32  }
 0x32c   : > { %1337 = vsyncadd (!%p1249_p2), %s1127_s10, 4294967264  ;;  %p21_p3 = scmp.ge.s32.totalorder %s1436_s16, 4   ;;  %s1738_s11 = smov %s1344_s12 }
 0x32d   : > { %s1739_s12 = smov %s1348_s13  ;;  %s1740_s13 = smov %s1447_s19 }
 0x32e   : > { %s1741_s14 = smov %s1436_s16  ;;  %23 = sbr.rel (!%p21_p3) target bundleno = 6 (0x6), region = 91 }
 0x335   :  { %1132 = vsyncpa [#allocation4], 1 }
 0x336   :  { %1134 = vsyncpa [#allocation4 + $0x1], 1 }

</bundles_post_ra>
